<compile_context>
chip_gen: v6e
topology: v6e:2x2x1
jax: 0.10.0
libtpu: 0.0.40
codegen_flags: <defaults>
</compile_context>

<pallas_src>
import functools

import numpy as np
import jax
import jax.numpy as jnp
from jax import lax
from jax.experimental import pallas as pl
from jax.experimental.pallas import tpu as pltpu


_MIB = 1024 * 1024


def _round_up(x, m):
    return ((x + m - 1) // m) * m


def _vmem_capacity_bytes():
    """Physical VMEM per TensorCore; conservative fallback if the query fails."""
    try:
        info = pltpu.get_tpu_info()
        cap = getattr(info, "vmem_capacity_bytes", None)
        if cap:
            return int(cap)
    except Exception:
        pass
    return 64 * _MIB  # v7x per-core size; a safe lower bound for v5e/v6e too.


def _pick_tm(n, n_pad, d, in_itemsize, out_itemsize, budget_bytes):
    """Largest row-strip height (multiple of 8, divisor of n) fitting the budget.

    Per-strip VMEM ~=  2 * n_pad * out_itemsize   (double-buffered output block)
                     + 4 * n * 4                  (f32 sim value + epilogue temps)
                     + 2 * d * in_itemsize        (double-buffered LHS tile)
    plus a fixed n * d * in_itemsize for the resident RHS.
    """
    per_row = 2 * n_pad * out_itemsize + 4 * n * 4 + 2 * d * in_itemsize
    fixed = n * d * in_itemsize
    avail = max(budget_bytes - fixed, 0)
    cap = max(8, min(512, avail // per_row))
    # Prefer >= 2 row tiles so the "parallel" axis shards across v7x's two
    # TensorCores (costs nothing on single-TC v5e/v6e).
    if n >= 16:
        cap = min(cap, max(n // 2, 8))
    best = None
    for t in range(8, min(cap, n) + 1, 8):
        if n % t == 0:
            best = t
    if best is None:
        # n < 8 or no multiple-of-8 divisor <= cap: fall back to a single strip.
        # TODO(synk): for large N with no small divisor, switch to pl.cdiv +
        # masked tail rows instead of one full-height strip.
        best = n
        assert per_row * n + fixed <= budget_bytes, (
            f"InfoNCE row strip of height {n} does not fit the VMEM budget; "
            "pick an N with a multiple-of-8 divisor or add tail masking.")
    return int(best)


# ---------------------------------------------------------------------------
# Prologue: row-wise L2 normalize once (single operand copy).
# ---------------------------------------------------------------------------
def _normalize_kernel(f_ref, out_ref):
    f = f_ref[...].astype(jnp.float32)
    # F.normalize(dim=1): x / max(||x||, 1e-12) == x * rsqrt(max(||x||^2, 1e-24))
    inv = lax.rsqrt(jnp.maximum(jnp.sum(f * f, axis=1, keepdims=True), 1e-24))
    out_ref[...] = (f * inv).astype(out_ref.dtype)


# ---------------------------------------------------------------------------
# Main kernel: per row strip, one MXU matmul against the resident RHS + fused
# diagonal-removal / positive-first reorder, single lane-dense store.
# ---------------------------------------------------------------------------
def _infonce_kernel(lhs_ref, rhs_ref, out_ref, *,
                    batch_size, n_views, n_total, inv_temp):
    i = pl.program_id(0)
    tm = lhs_ref.shape[0]
    n = n_total
    b = batch_size
    n_pos = n_views - 1
    n_neg = n - n_views
    n_pad = out_ref.shape[1]

    # Fold 1/temperature into the LHS tile (TM*D work instead of TM*N).
    lhs = lhs_ref[...] * inv_temp
    # A @ B^T expressed natively: contract the last dim of both operands,
    # accumulate in f32 on the MXU.
    sim = lax.dot_general(lhs, rhs_ref[...],
                          dimension_numbers=(((1,), (1,)), ((), ())),
                          preferred_element_type=jnp.float32)          # [TM, N]

    row = i * tm + lax.broadcasted_iota(jnp.int32, (tm, 1), 0)
    s = row % b            # sample id per row  ([TM,1] only -> negligible)
    vi = row // b          # view id per row
    col = lax.broadcasted_iota(jnp.int32, (tm, n), 1)

    # Same-sample (excluded) columns are exactly {s, s+B, ..., s+(V-1)B}:
    # n_views ==/> compares replace the old int mod/div over [TM,N] iotas.
    excl = jnp.zeros((tm, n), jnp.bool_)
    cnt_lt = jnp.zeros((tm, n), jnp.int32)       # excluded cols strictly left
    for v in range(n_views):
        tgt_v = s + v * b
        excl = jnp.logical_or(excl, col == tgt_v)
        cnt_lt = cnt_lt + (col > tgt_v).astype(jnp.int32)

    # Positives: same-sample off-diagonal columns, in increasing column order
    # (matches PyTorch's boolean-mask row-major extraction).
    # TODO(synk): for n_views == 2 these could be TM*D row-wise dots against a
    # paired-row tile (extra BlockSpec) instead of [TM,N] masked scans.
    pos_cols = []
    for q in range(n_pos):
        v_q = q + (q >= vi).astype(jnp.int32)    # skip own view index
        tgt = s + v_q * b
        pos_cols.append(jnp.sum(jnp.where(col == tgt, sim, 0.0),
                                axis=1, keepdims=True))

    # Negatives: compact non-excluded columns leftwards.  Column j lands at
    # slot j - cnt_lt(j) (shift in 0..n_views); realized with n_views+1 static
    # slices + selects — no gather, no cross-lane rotates through VMEM.
    neg = jnp.zeros((tm, n_neg), jnp.float32)
    for m in range(n_views + 1):
        keep = jnp.logical_and(jnp.logical_not(excl), cnt_lt == m)
        contrib = jnp.where(keep, sim, 0.0)
        neg = neg + contrib[:, m:m + n_neg]

    pieces = pos_cols + [neg]
    if n_pad > n - 1:                            # lane padding -> -inf
        pieces.append(jnp.full((tm, n_pad - (n - 1)), -jnp.inf, jnp.float32))
    # Single full-width, lane-dense store (n_pad is a multiple of 128).
    out_ref[...] = jnp.concatenate(pieces, axis=1).astype(out_ref.dtype)


def infonce_loss_forward(features, batch_size, n_views=2, temperature=0.7,
                         sim_fn="dot", compute_dtype=jnp.bfloat16,
                         logits_dtype=jnp.float32, return_padded=False):
    """JAX/Pallas equivalent of InfoNCELoss.forward -> (logits, labels)."""
    n, d = features.shape
    assert n == batch_size * n_views
    # 'cosine' on L2-normalized rows is identical to 'dot'.
    assert sim_fn in ("dot", "cosine")

    n_pad = _round_up(n - 1, 128)
    in_itemsize = jnp.dtype(compute_dtype).itemsize
    out_itemsize = jnp.dtype(logits_dtype).itemsize

    vmem_cap = _vmem_capacity_bytes()
    budget = int(vmem_cap * 0.55)                 # tiling budget with headroom
    vmem_limit = min(int(vmem_cap * 0.75), 128 * _MIB)

    # The normalized RHS stays resident in VMEM for the whole kernel; realistic
    # contrastive configs are tiny (e.g. 4096 x 128 bf16 = 1 MiB).
    assert n * d * in_itemsize <= budget // 2, (
        "normalized feature matrix too large to keep resident in VMEM; "
        "re-introduce a column grid axis for this configuration")

    tm = _pick_tm(n, n_pad, d, in_itemsize, out_itemsize, budget)

    # ---- prologue: normalize rows once (single low-precision copy) ---------
    fn = pl.pallas_call(
        _normalize_kernel,
        out_shape=jax.ShapeDtypeStruct((n, d), compute_dtype),
        grid=(n // tm,),
        in_specs=[pl.BlockSpec((tm, d), lambda i: (i, 0))],
        out_specs=pl.BlockSpec((tm, d), lambda i: (i, 0)),
        compiler_params=pltpu.CompilerParams(
            dimension_semantics=("parallel",)),
    )(features)

    # ---- main: resident-RHS similarity + fused reorder, lane-dense output --
    cost = pl.CostEstimate(
        flops=2 * n * n * d,
        transcendentals=0,
        bytes_accessed=2 * n * d * in_itemsize + n * n_pad * out_itemsize)

    kernel = functools.partial(
        _infonce_kernel, batch_size=batch_size, n_views=n_views,
        n_total=n, inv_temp=float(1.0 / temperature))
    logits_padded = pl.pallas_call(
        kernel,
        out_shape=jax.ShapeDtypeStruct((n, n_pad), logits_dtype),
        grid=(n // tm,),
        in_specs=[pl.BlockSpec((tm, d), lambda i: (i, 0)),
                  pl.BlockSpec((n, d), lambda i: (0, 0))],   # resident RHS
        out_specs=pl.BlockSpec((tm, n_pad), lambda i: (i, 0)),
        compiler_params=pltpu.CompilerParams(
            dimension_semantics=("parallel",),
            vmem_limit_bytes=vmem_limit),
        cost_estimate=cost,
    )(fn, fn)

    # TODO(synk): PyTorch returns int64 ("long") labels; JAX x64 is off by
    # default, so labels are int32 here.
    labels = jnp.zeros((n,), dtype=jnp.int32)
    if return_padded:
        return logits_padded, labels
    return logits_padded[:, :n - 1], labels


def _reference_forward(features_np, batch_size, n_views, temperature):
    """Pure-numpy reference replicating the PyTorch forward semantics."""
    n, _ = features_np.shape
    lab = np.concatenate([np.arange(batch_size)] * n_views)
    labels = (lab[None, :] == lab[:, None])
    norm = np.maximum(np.linalg.norm(features_np, axis=1, keepdims=True), 1e-12)
    f = features_np / norm
    sim = f @ f.T
    eye = np.eye(n, dtype=bool)
    labels_nd = labels[~eye].reshape(n, -1)
    sim_nd = sim[~eye].reshape(n, -1)
    pos = sim_nd[labels_nd].reshape(n, -1)
    neg = sim_nd[~labels_nd].reshape(n, -1)
    logits = np.concatenate([pos, neg], axis=1) / temperature
    return logits, np.zeros((n,), dtype=np.int64)


if __name__ == "__main__":
    # Small config consistent with the module (batch of 4, two views, 32-d).
    batch_size, n_views, temperature, hidden = 4, 2, 0.7, 32
    n = batch_size * n_views

    key = jax.random.PRNGKey(0)
    features = jax.random.normal(key, (n, hidden), dtype=jnp.float32)

    ref_logits, _ = _reference_forward(
        np.asarray(features), batch_size, n_views, temperature)

    # f32 operands + f32 logits: tight check of the full fused pipeline.
    logits_f32, labels = infonce_loss_forward(
        features, batch_size, n_views=n_views, temperature=temperature,
        compute_dtype=jnp.float32, logits_dtype=jnp.float32)
    logits_f32 = jax.block_until_ready(logits_f32)
    labels = jax.block_until_ready(labels)
    np.testing.assert_allclose(np.asarray(logits_f32), ref_logits,
                               rtol=1e-5, atol=1e-5)
    assert logits_f32.shape == (n, n - 1)
    assert labels.shape == (n,) and np.all(np.asarray(labels) == 0)

    # Fast path: bf16 MXU operands + bf16 logits (relaxed tolerance).
    logits_bf16, _ = infonce_loss_forward(
        features, batch_size, n_views=n_views, temperature=temperature,
        compute_dtype=jnp.bfloat16, logits_dtype=jnp.bfloat16)
    logits_bf16 = jax.block_until_ready(logits_bf16)
    np.testing.assert_allclose(np.asarray(logits_bf16.astype(jnp.float32)),
                               ref_logits, rtol=2e-2, atol=2e-2)

    # Slightly larger config to exercise a multi-strip (>= 2 row tiles) grid.
    bs2, hid2 = 64, 64
    n2 = bs2 * n_views
    feats2 = jax.random.normal(jax.random.PRNGKey(1), (n2, hid2), jnp.float32)
    ref2, _ = _reference_forward(np.asarray(feats2), bs2, n_views, temperature)
    out2, _ = infonce_loss_forward(
        feats2, bs2, n_views=n_views, temperature=temperature,
        compute_dtype=jnp.float32, logits_dtype=jnp.float32)
    out2 = jax.block_until_ready(out2)
    np.testing.assert_allclose(np.asarray(out2), ref2, rtol=1e-4, atol=1e-4)

    print("KERNEL_OK")
</pallas_src>

<mosaic_0001>
module attributes {stable_mosaic.version = 11 : i64} {
  func.func @_normalize_kernel(%arg0: i32, %arg1: memref<8x32xf32, #tpu.memory_space<vmem>>, %arg2: memref<8x32xf32, #tpu.memory_space<vmem>>) attributes {dimension_semantics = [#tpu.dimension_semantics<parallel>], iteration_bounds = array<i64: 1>, scalar_prefetch = 0 : i64, scratch_operands = 0 : i64, tpu.core_type = #tpu.core_type<tc>, window_params = [{transform_indices = @transform_0, window_bounds = array<i64: 8, 32>}, {transform_indices = @transform_1, window_bounds = array<i64: 8, 32>}]} {
    %c0 = arith.constant 0 : index
    %c0_0 = arith.constant 0 : index
    %0 = vector.load %arg1[%c0, %c0_0] : memref<8x32xf32, #tpu.memory_space<vmem>>, vector<8x32xf32>
    %1 = arith.mulf %0, %0 : vector<8x32xf32>
    %cst = arith.constant dense<0.000000e+00> : vector<8xf32>
    %2 = vector.multi_reduction <add>, %1, %cst [1] : vector<8x32xf32> to vector<8xf32>
    %3 = vector.shape_cast %2 : vector<8xf32> to vector<8x1xf32>
    %cst_1 = arith.constant 1.000000e-24 : f32
    %4 = vector.broadcast %cst_1 : f32 to vector<8x1xf32>
    %5 = arith.maximumf %3, %4 : vector<8x1xf32>
    %6 = math.rsqrt %5 : vector<8x1xf32>
    %7 = vector.broadcast %6 : vector<8x1xf32> to vector<8x32xf32>
    %8 = arith.mulf %0, %7 : vector<8x32xf32>
    %c0_2 = arith.constant 0 : index
    %c0_3 = arith.constant 0 : index
    %9 = vector.load %arg2[%c0_2, %c0_3] : memref<8x32xf32, #tpu.memory_space<vmem>>, vector<8x32xf32>
    tpu.vector_store %arg2[%c0_2, %c0_3], %8 {strides = array<i32>} : memref<8x32xf32, #tpu.memory_space<vmem>>, vector<8x32xf32>,
    return
  }
  func.func @transform_0(%arg0: i32) -> (i32, i32) {
    %c0_i32 = arith.constant 0 : i32
    %c0_i32_0 = arith.constant 0 : i32
    return %arg0, %c0_i32 : i32, i32
  }
  func.func @transform_1(%arg0: i32) -> (i32, i32) {
    %c0_i32 = arith.constant 0 : i32
    %c0_i32_0 = arith.constant 0 : i32
    return %arg0, %c0_i32 : i32, i32
  }
}

</mosaic_0001>

<bundles_post_ra>
// kernel: tpu_custom_call.1
= control target key start
LH: loop header
LB: loop body
LE: loop exit
PB: predicated region body
PF: predicated region fallthrough
CT: control target
= control target key end

     0   :  { %6 = vsyncpa [#allocation3], 0  ;;  %s112_s0 = inlined_call_operand.hbm [shape: f32[8,32], index: 0, kind: input, shape index: {}]   ;;  %s113_s1 = inlined_call_operand.hbm [shape: f32[8,32], index: 1, kind: output, shape index: {}]  }
   0x1   :  { %7 = vsyncpa [#allocation4], 0  ;;  %s94_s6 = smov [#allocation2]  }
   0x2   :  { %s14_s7 = sshll.u32 %s94_s6, 4  ;;  %s15_s7 = int_to_ptr.vmem [resolvable:$true] %s14_s7 }
   0x3   :  { %s58_s8 = scalar_lea.vmem %s15_s7, 128  ;;  %p63_p1 = scmp.lt.s32.totalorder %s15_s7, %s15_s7 }
   0x4   :  { %p59_p0 = scmp.ne.s32.totalorder %s15_s7, %s58_s8  ;;  %p64_p2 = scmp.lt.s32.totalorder %s58_s8, %s58_s8 }
   0x6   :  { %p65_p3 = por %p64_p2, %p63_p1 }
   0x8   :  { %p66_p4 = pnand %p65_p3, %p59_p0 }
   0xa   :  { %69 = shalt.err (!%p66_p4)
}
   0xb   :  { %17 = dma.hbm_to_vmem [thread:$0]  %s112_s0, 128, %s15_s7, [#allocation3]  }
   0xc   :  { %90 = dma.done.wait [#allocation3], 128  }
   0xd   :  { %91 = vsyncadd [#allocation3], 4294967168  ;;  %v21_v0 = vld [vmem:[#allocation2] sm:$0xff]  ;;  %vm23_vm0 = vcmask 261120   ;;  %s95_s11 = smov [#allocation5]  }
   0xe   :  { %v22_v1 = vmul.f32 %v21_v0, %v21_v0  ;;  %s37_s12 = sshll.u32 %s95_s11, 4  ;;  %s38_s12 = int_to_ptr.vmem [resolvable:$true] %s37_s12 }
   0xf   :  { %s70_s13 = scalar_lea.vmem %s38_s12, 128  ;;  %p75_p6 = scmp.lt.s32.totalorder %s38_s12, %s38_s12 }
  0x10   :  { %v24_v2 = vsel %vm23_vm0, %v22_v1, 0.0  ;;  %p71_p5 = scmp.ne.s32.totalorder %s38_s12, %s70_s13  ;;  %p76_p7 = scmp.lt.s32.totalorder %s70_s13, %s70_s13 }
  0x11   :  { %25 = vadd.xlane.f32.xlu0 %v24_v2 }
  0x12   :  { %p77_p8 = por %p76_p7, %p75_p6 }
  0x14   :  { %p78_p9 = pnand %p77_p8, %p71_p5 }
  0x9a   :  { %v26_v3 = vpop.xlane.xlu0 %25 }
  0x9b   :  { %v27_v4 = vmax.f32 %v26_v3, 1e-24 }
  0x9d   :  { %48 = vrsqrt.f32 %v27_v4 }
  0xaa   :  { %v49_v5 = vpop.eup %48 }
  0xab   :  { %v29_v6 = vmul.f32 %v49_v5, %v21_v0 }
  0xad   :  { %30 = vst.msk [vmem:[#allocation5] sm:$0xff] %vm23_vm0, %v29_v6 }
  0xae   :  { %81 = shalt.err (!%p78_p9)
}
  0xaf   :  { %40 = dma.vmem_to_hbm [thread:$0]  %s38_s12, 128, %s113_s1, [#allocation4]  }
  0xb0   :  { %92 = dma.done.wait [#allocation4], 128  }
  0xb1   :  { %93 = vsyncadd [#allocation4], 4294967168 }
  0xb2   :  { %44 = vsyncpa [#allocation3], 1 }
  0xb3   :  { %45 = vsyncpa [#allocation4], 1 }

</bundles_post_ra>
